<compile_context>
chip_gen: v6e
topology: v6e:2x2x1
jax: 0.10.0
libtpu: 0.0.40
codegen_flags: <defaults>
</compile_context>

<pallas_src>
import functools

import jax
import jax.numpy as jnp
import numpy as np
from jax.experimental import pallas as pl
from jax.experimental.pallas import tpu as pltpu


# ----------------------------- Pallas kernels ------------------------------

def _gru_ode_euler_kernel(dt_ref, h_ref, urz_ref, uh_ref, brz_ref, bh_ref,
                          out_ref):
    """One explicit-Euler step of mgn_GRUODE on the flat (N, P*D) state.

    urz_ref: (P*D, 2*P*D) block-diagonal [U_r | U_z] (gate-concat on lanes)
    uh_ref : (P*D, P*D)   block-diagonal U_h
    """
    pd = h_ref.shape[-1]
    dt = dt_ref[0, 0]
    h = h_ref[...]                                                   # (N, PD)
    rz = jnp.dot(h, urz_ref[...],
                 preferred_element_type=jnp.float32) + brz_ref[...]  # (N, 2PD)
    r = jax.nn.sigmoid(rz[:, :pd])
    z = jax.nn.sigmoid(rz[:, pd:])
    h_tilde = jnp.tanh(
        jnp.dot(r * h, uh_ref[...], preferred_element_type=jnp.float32)
        + bh_ref[...])
    # dh = (1 - z) * (h_tilde - h); Euler step with dt folded into the gate.
    out_ref[...] = h + (dt * (1.0 - z)) * (h_tilde - h)


def _gru_update_kernel(h_ref, x_ref, m_ref, w_ref, urz_ref, uh_ref, b_ref,
                       out_ref):
    """mgn_GRU (GRU-Bayes) update on the observed rows, flat (Nobs, P*D).

    w_ref  : (2*P, 3*P*D) block-diagonal [W_r | W_z | W_h]
    urz_ref: (P*D, 2*P*D) block-diagonal [U_r | U_z]
    uh_ref : (P*D, P*D)   block-diagonal U_h
    b_ref  : (1, 3*P*D)   [b_r | b_z | b_h]
    """
    pd = h_ref.shape[-1]
    h = h_ref[...]                                                   # (Nobs, PD)
    x = x_ref[...]                                                   # (Nobs, 2P)
    m = m_ref[...]                                                   # (Nobs, PD)
    xw = jnp.dot(x, w_ref[...],
                 preferred_element_type=jnp.float32) + b_ref[...]    # (Nobs, 3PD)
    hu = jnp.dot(h, urz_ref[...],
                 preferred_element_type=jnp.float32)                 # (Nobs, 2PD)
    r = jax.nn.sigmoid(xw[:, :pd] + hu[:, :pd])
    z = jax.nn.sigmoid(xw[:, pd:2 * pd] + hu[:, pd:])
    h_tilde = jnp.tanh(
        xw[:, 2 * pd:]
        + jnp.dot(r * h, uh_ref[...], preferred_element_type=jnp.float32))
    h_new = z * h + (1.0 - z) * h_tilde
    out_ref[...] = h * (1.0 - m) + h_new * m                         # mask gate


_VMEM = pl.BlockSpec(memory_space=pltpu.MemorySpace.VMEM)
_SMEM = pl.BlockSpec(memory_space=pltpu.MemorySpace.SMEM)


def gru_ode_euler_step(h, delta_t, kp):
    """h: (N, P*D) float32.  Returns h + delta_t * mgn_GRUODE(h)."""
    N, PD = h.shape
    dt_arr = jnp.asarray(delta_t, jnp.float32).reshape(1, 1)
    return pl.pallas_call(
        _gru_ode_euler_kernel,
        out_shape=jax.ShapeDtypeStruct((N, PD), jnp.float32),
        in_specs=[_SMEM, _VMEM, _VMEM, _VMEM, _VMEM, _VMEM],
        out_specs=_VMEM,
    )(dt_arr, h, kp["U_rz_c_bd"], kp["U_h_c_bd"], kp["b_rz_c"], kp["b_h_c"])


def gru_bayes_update(h_obs, x_flat, m_flat, kp):
    """h_obs: (Nobs, P*D), x_flat: (Nobs, 2*P), m_flat: (Nobs, P*D)."""
    Nobs, PD = h_obs.shape
    return pl.pallas_call(
        _gru_update_kernel,
        out_shape=jax.ShapeDtypeStruct((Nobs, PD), jnp.float32),
        in_specs=[_VMEM] * 7,
        out_specs=_VMEM,
    )(h_obs, x_flat, m_flat,
      kp["W_rzh_d_bd"], kp["U_rz_d_bd"], kp["U_h_d_bd"], kp["b_rzh_d"])


# ------------------------------ Module wrapper ------------------------------

class MgnCellPallas:
    """JAX/Pallas port of mgn_Cell (ODE solver fixed to explicit Euler)."""

    def __init__(self, input_size, n_dim, solver="euler", key=None):
        assert solver == "euler"
        self.input_size = input_size
        self.n_dim = n_dim
        if key is None:
            key = jax.random.PRNGKey(0)
        ks = jax.random.split(key, 9)
        P, D = input_size, n_dim

        def xavier(k, shape):                       # ~ nn.init.xavier_uniform_
            fan_in, fan_out = shape[1], shape[2]
            bound = float(np.sqrt(6.0 / (fan_in + fan_out)))
            return jax.random.uniform(k, shape, jnp.float32, -bound, bound)

        def orthogonal(k, shape):                   # ~ nn.init.orthogonal_
            a = jax.random.normal(k, shape, jnp.float32)
            q, _ = jnp.linalg.qr(a)
            return q.astype(jnp.float32)

        # Raw per-input-dimension parameters (same layout/init as PyTorch).
        self.params = {
            # mgn_GRUODE parameters
            "U_r_c": orthogonal(ks[0], (P, D, D)),
            "U_z_c": orthogonal(ks[1], (P, D, D)),
            "U_h_c": orthogonal(ks[2], (P, D, D)),
            "b_r_c": jnp.zeros((P, D), jnp.float32),
            "b_z_c": jnp.zeros((P, D), jnp.float32),
            "b_h_c": jnp.zeros((P, D), jnp.float32),
            # mgn_GRU (GRU-Bayes) parameters
            "W_r_d": xavier(ks[3], (P, 2, D)),
            "W_z_d": xavier(ks[4], (P, 2, D)),
            "W_h_d": xavier(ks[5], (P, 2, D)),
            "U_r_d": orthogonal(ks[6], (P, D, D)),
            "U_z_d": orthogonal(ks[7], (P, D, D)),
            "U_h_d": orthogonal(ks[8], (P, D, D)),
            "b_r_d": jnp.zeros((P, D), jnp.float32),
            "b_z_d": jnp.zeros((P, D), jnp.float32),
            "b_h_d": jnp.zeros((P, D), jnp.float32),
        }
        # Kernel-layout parameters, built ONCE at construction (block-diagonal
        # weights + gate concatenation + flattened biases).  Hoisted here so
        # per-call glue is just a gather/reshape of activations.
        self.kparams = self._build_kernel_params(self.params)

    @staticmethod
    def _block_diag(w):
        """w: (P, a, b) per-dim weights -> block-diagonal (P*a, P*b)."""
        Pn, a, b = w.shape
        eye = jnp.eye(Pn, dtype=w.dtype)
        return jnp.einsum("pq,pij->piqj", eye, w).reshape(Pn * a, Pn * b)

    def _build_kernel_params(self, p):
        bd = self._block_diag
        flat = lambda b_: b_.reshape(1, -1)
        return {
            # ODE path: [r|z] gate weights concatenated on the output axis.
            "U_rz_c_bd": jnp.concatenate([bd(p["U_r_c"]), bd(p["U_z_c"])], axis=1),
            "U_h_c_bd": bd(p["U_h_c"]),
            "b_rz_c": jnp.concatenate([flat(p["b_r_c"]), flat(p["b_z_c"])], axis=1),
            "b_h_c": flat(p["b_h_c"]),
            # Update path: input weights [r|z|h] and recurrent [r|z] fused.
            "W_rzh_d_bd": jnp.concatenate(
                [bd(p["W_r_d"]), bd(p["W_z_d"]), bd(p["W_h_d"])], axis=1),
            "U_rz_d_bd": jnp.concatenate([bd(p["U_r_d"]), bd(p["U_z_d"])], axis=1),
            "U_h_d_bd": bd(p["U_h_d"]),
            "b_rzh_d": jnp.concatenate(
                [flat(p["b_r_d"]), flat(p["b_z_d"]), flat(p["b_h_d"])], axis=1),
        }

    def __call__(self, current_time, mgn_h, delta_t,
                 X_obs=None, M_obs=None, i_obs=None, update=False):
        P, D = self.input_size, self.n_dim
        if update:
            assert X_obs is not None
            assert i_obs is not None
            idx = jnp.asarray(i_obs)
            h_obs = mgn_h[idx]                                        # (Nobs, P*D)
            nobs = h_obs.shape[0]
            x_flat = X_obs.astype(jnp.float32).reshape(nobs, P * 2)   # (Nobs, 2P)
            m_flat = jnp.broadcast_to(
                M_obs.astype(jnp.float32)[:, :, None], (nobs, P, D)
            ).reshape(nobs, P * D)                                    # (Nobs, P*D)
            h_new = gru_bayes_update(h_obs, x_flat, m_flat, self.kparams)
            # TODO(synk): for large trajectory counts, move this gather/scatter
            # in-kernel (PrefetchScalarGridSpec scalar-prefetched i_obs +
            # input_output_aliases) so HBM traffic is O(Nobs*P*D), not O(N*P*D).
            return mgn_h.at[idx].set(h_new)
        else:
            # odeint(mgn_ode, h, [t, t + delta_t], method="euler")[-1]
            return gru_ode_euler_step(mgn_h, delta_t, self.kparams)


# --------------------------- pure-JAX references ----------------------------

def _ref_ode_step(mgn_h, dt, params, P, D):
    ein = functools.partial(jnp.einsum, precision=jax.lax.Precision.HIGHEST)
    N = mgn_h.shape[0]
    h = mgn_h.reshape(N, P, D)
    r = jax.nn.sigmoid(ein('bij,ijk->bik', h, params["U_r_c"]) + params["b_r_c"])
    z = jax.nn.sigmoid(ein('bij,ijk->bik', h, params["U_z_c"]) + params["b_z_c"])
    ht = jnp.tanh(ein('bij,ijk->bik', r * h, params["U_h_c"]) + params["b_h_c"])
    dh = (1.0 - z) * (ht - h)
    return (h + dt * dh).reshape(N, P * D)


def _ref_update(mgn_h, X_obs, M_obs, i_obs, params, P, D):
    ein = functools.partial(jnp.einsum, precision=jax.lax.Precision.HIGHEST)
    h = mgn_h[i_obs].reshape(-1, P, D)
    M = M_obs.astype(jnp.float32)[..., None]
    r = jax.nn.sigmoid(ein('bij,ijk->bik', X_obs, params["W_r_d"])
                       + ein('bij,ijk->bik', h, params["U_r_d"]) + params["b_r_d"])
    z = jax.nn.sigmoid(ein('bij,ijk->bik', X_obs, params["W_z_d"])
                       + ein('bij,ijk->bik', h, params["U_z_d"]) + params["b_z_d"])
    ht = jnp.tanh(ein('bij,ijk->bik', X_obs, params["W_h_d"])
                  + ein('bij,ijk->bik', r * h, params["U_h_d"]) + params["b_h_d"])
    hn = z * h + (1.0 - z) * ht
    hn = h * (1.0 - M) + hn * M
    return mgn_h.at[jnp.asarray(i_obs)].set(hn.reshape(-1, P * D))


# ----------------------------------- main -----------------------------------

if __name__ == "__main__":
    P, D = 4, 32          # input_size, n_dim  (P*D = 128: one full lane tile)
    N = 8                 # number of trajectories (batch)
    NOBS = 4              # observed trajectories at this event

    key = jax.random.PRNGKey(0)
    k_h, k_x, k_m, k_param = jax.random.split(key, 4)

    cell = MgnCellPallas(P, D, solver="euler", key=k_param)

    mgn_h = jax.random.normal(k_h, (N, P * D), jnp.float32)
    X_obs = jax.random.normal(k_x, (NOBS, P, 2), jnp.float32)
    M_obs = (jax.random.uniform(k_m, (NOBS, P)) > 0.5).astype(jnp.float32)
    i_obs = jnp.array([0, 2, 5, 7], dtype=jnp.int32)
    current_time, delta_t = 0.0, 0.05

    # --- ODE propagation path (update=False) ---
    h_ode = cell(current_time, mgn_h, delta_t, update=False)
    h_ode = jax.block_until_ready(h_ode)
    h_ode_ref = _ref_ode_step(mgn_h, delta_t, cell.params, P, D)
    np.testing.assert_allclose(np.asarray(h_ode), np.asarray(h_ode_ref),
                               rtol=2e-3, atol=2e-3)

    # --- observation (GRU-Bayes) update path (update=True) ---
    h_upd = cell(current_time, mgn_h, delta_t,
                 X_obs=X_obs, M_obs=M_obs, i_obs=i_obs, update=True)
    h_upd = jax.block_until_ready(h_upd)
    h_upd_ref = _ref_update(mgn_h, X_obs, M_obs, i_obs, cell.params, P, D)
    np.testing.assert_allclose(np.asarray(h_upd), np.asarray(h_upd_ref),
                               rtol=2e-3, atol=2e-3)

    print("KERNEL_OK")
</pallas_src>

<mosaic_0001>
module attributes {stable_mosaic.version = 11 : i64} {
  func.func @_gru_ode_euler_kernel(%arg0: memref<1x1xf32, #tpu.memory_space<smem>>, %arg1: memref<8x128xf32, #tpu.memory_space<vmem>>, %arg2: memref<128x256xf32, #tpu.memory_space<vmem>>, %arg3: memref<128x128xf32, #tpu.memory_space<vmem>>, %arg4: memref<1x256xf32, #tpu.memory_space<vmem>>, %arg5: memref<1x128xf32, #tpu.memory_space<vmem>>, %arg6: memref<8x128xf32, #tpu.memory_space<vmem>>) attributes {dimension_semantics = [], scalar_prefetch = 0 : i64, scratch_operands = 0 : i64, tpu.core_type = #tpu.core_type<tc>} {
    %c0 = arith.constant 0 : index
    %c0_0 = arith.constant 0 : index
    %0 = memref.load %arg0[%c0, %c0_0] : memref<1x1xf32, #tpu.memory_space<smem>>
    %c0_1 = arith.constant 0 : index
    %c0_2 = arith.constant 0 : index
    %1 = vector.load %arg1[%c0_1, %c0_2] : memref<8x128xf32, #tpu.memory_space<vmem>>, vector<8x128xf32>
    %c0_3 = arith.constant 0 : index
    %c0_4 = arith.constant 0 : index
    %2 = vector.load %arg2[%c0_3, %c0_4] : memref<128x256xf32, #tpu.memory_space<vmem>>, vector<128x256xf32>
    %cst = arith.constant dense<0.000000e+00> : vector<8x256xf32>
    %3 = tpu.matmul %1, %2, %cst {dimension_numbers = #tpu.dot_dimension_numbers<[1], [0], [0], [1], [0, 0, 1, 1], [], []>} : vector<8x128xf32>, vector<128x256xf32>, vector<8x256xf32> -> vector<8x256xf32>
    %c0_5 = arith.constant 0 : index
    %c0_6 = arith.constant 0 : index
    %4 = vector.load %arg4[%c0_5, %c0_6] : memref<1x256xf32, #tpu.memory_space<vmem>>, vector<1x256xf32>
    %5 = vector.broadcast %4 : vector<1x256xf32> to vector<8x256xf32>
    %6 = arith.addf %3, %5 : vector<8x256xf32>
    %7 = vector.extract_strided_slice %6 {offsets = [0, 0], sizes = [8, 128], strides = [1, 1]} : vector<8x256xf32> to vector<8x128xf32>
    %8 = arith.negf %7 : vector<8x128xf32>
    %9 = math.exp %8 : vector<8x128xf32>
    %cst_7 = arith.constant 1.000000e+00 : f32
    %10 = vector.broadcast %cst_7 : f32 to vector<8x128xf32>
    %11 = arith.addf %10, %9 : vector<8x128xf32>
    %12 = arith.divf %10, %11 : vector<8x128xf32>
    %13 = vector.extract_strided_slice %6 {offsets = [0, 128], sizes = [8, 128], strides = [1, 1]} : vector<8x256xf32> to vector<8x128xf32>
    %14 = arith.negf %13 : vector<8x128xf32>
    %15 = math.exp %14 : vector<8x128xf32>
    %cst_8 = arith.constant 1.000000e+00 : f32
    %16 = vector.broadcast %cst_8 : f32 to vector<8x128xf32>
    %17 = arith.addf %16, %15 : vector<8x128xf32>
    %18 = arith.divf %16, %17 : vector<8x128xf32>
    %19 = arith.mulf %12, %1 : vector<8x128xf32>
    %c0_9 = arith.constant 0 : index
    %c0_10 = arith.constant 0 : index
    %20 = vector.load %arg3[%c0_9, %c0_10] : memref<128x128xf32, #tpu.memory_space<vmem>>, vector<128x128xf32>
    %cst_11 = arith.constant dense<0.000000e+00> : vector<8x128xf32>
    %21 = tpu.matmul %19, %20, %cst_11 {dimension_numbers = #tpu.dot_dimension_numbers<[1], [0], [0], [1], [0, 0, 1, 1], [], []>} : vector<8x128xf32>, vector<128x128xf32>, vector<8x128xf32> -> vector<8x128xf32>
    %c0_12 = arith.constant 0 : index
    %c0_13 = arith.constant 0 : index
    %22 = vector.load %arg5[%c0_12, %c0_13] : memref<1x128xf32, #tpu.memory_space<vmem>>, vector<1x128xf32>
    %23 = vector.broadcast %22 : vector<1x128xf32> to vector<8x128xf32>
    %24 = arith.addf %21, %23 : vector<8x128xf32>
    %25 = math.tanh %24 : vector<8x128xf32>
    %cst_14 = arith.constant 1.000000e+00 : f32
    %26 = vector.broadcast %cst_14 : f32 to vector<8x128xf32>
    %27 = arith.subf %26, %18 : vector<8x128xf32>
    %28 = vector.broadcast %0 : f32 to vector<8x128xf32>
    %29 = arith.mulf %28, %27 : vector<8x128xf32>
    %30 = arith.subf %25, %1 : vector<8x128xf32>
    %31 = arith.mulf %29, %30 : vector<8x128xf32>
    %32 = arith.addf %1, %31 : vector<8x128xf32>
    %c0_15 = arith.constant 0 : index
    %c0_16 = arith.constant 0 : index
    %33 = vector.load %arg6[%c0_15, %c0_16] : memref<8x128xf32, #tpu.memory_space<vmem>>, vector<8x128xf32>
    tpu.vector_store %arg6[%c0_15, %c0_16], %32 {strides = array<i32>} : memref<8x128xf32, #tpu.memory_space<vmem>>, vector<8x128xf32>,
    return
  }
}

</mosaic_0001>

<bundles_post_ra>
// kernel: tpu_custom_call.1
= control target key start
LH: loop header
LB: loop body
LE: loop exit
PB: predicated region body
PF: predicated region fallthrough
CT: control target
= control target key end

     0   :  { %12 = vsyncpa [#allocation4], 0  ;;  %s562_s0 = inlined_call_operand.<no memory space> [shape: f32[1,1], index: 0, kind: input, shape index: {}]   ;;  %s563_s1 = inlined_call_operand.hbm [shape: f32[8,128], index: 1, kind: input, shape index: {}]   ;;  %s564_s2 = inlined_call_operand.hbm [shape: f32[128,256], index: 2, kind: input, shape index: {}]   ;;  %s565_s3 = inlined_call_operand.hbm [shape: f32[128,128], index: 3, kind: input, shape index: {}]   ;;  %s566_s4 = inlined_call_operand.vmem [shape: f32[1,256], index: 4, kind: input, shape index: {}]   ;;  %s567_s5 = inlined_call_operand.vmem [shape: f32[1,128], index: 5, kind: input, shape index: {}]   ;;  %s568_s6 = inlined_call_operand.hbm [shape: f32[8,128], index: 6, kind: output, shape index: {}]  }
   0x1   :  { %13 = vsyncpa [#allocation7], 0 }
   0x2   :  { %14 = vsyncpa [#allocation5], 0  ;;  %s472_s21 = smov [#allocation6]  }
   0x3   :  { %s32_s22 = sshll.u32 %s472_s21, 4  ;;  %s33_s22 = int_to_ptr.vmem [resolvable:$true] %s32_s22 }
   0x4   :  { %s394_s23 = scalar_lea.vmem %s33_s22, 4096  ;;  %p399_p1 = scmp.lt.s32.totalorder %s33_s22, %s33_s22 }
   0x5   :  { %p395_p0 = scmp.ne.s32.totalorder %s33_s22, %s394_s23  ;;  %p400_p2 = scmp.lt.s32.totalorder %s394_s23, %s394_s23 }
   0x7   :  { %p401_p3 = por %p400_p2, %p399_p1 }
   0x9   :  { %p402_p4 = pnand %p401_p3, %p395_p0 }
   0xb   :  { %405 = shalt.err (!%p402_p4)
}
   0xc   :  { %s473_s24 = smov 256   ;;  %s474_s25 = smov 16  }
   0xd   :  { %38 = dma.hbm_to_vmem [thread:$0]  %s564_s2, 4096, %s33_s22, [#allocation7], %s473_s24, %s473_s24, %s474_s25  }
   0xe   :  { %s475_s28 = smov [#allocation3]   ;;  %s476_s30 = smov [#allocation8]  }
   0xf   :  { %s23_s29 = sshll.u32 %s475_s28, 4  ;;  %s44_s7 = sshll.u32 %s476_s30, 4  ;;  %s24_s29 = int_to_ptr.vmem [resolvable:$true] %s23_s29  ;;  %s45_s7 = int_to_ptr.vmem [resolvable:$true] %s44_s7 }
  0x10   :  { %s414_s8 = scalar_lea.vmem %s24_s29, 128  ;;  %p419_p6 = scmp.lt.s32.totalorder %s24_s29, %s24_s29 }
  0x11   :  { %p415_p5 = scmp.ne.s32.totalorder %s24_s29, %s414_s8  ;;  %p420_p7 = scmp.lt.s32.totalorder %s414_s8, %s414_s8 }
  0x13   :  { %p421_p8 = por %p420_p7, %p419_p6 }
  0x15   :  { %p422_p9 = pnand %p421_p8, %p415_p5 }
  0x17   :  { %425 = shalt.err (!%p422_p9)
}
  0x18   :  { %26 = dma.hbm_to_vmem [thread:$0]  %s563_s1, 128, %s24_s29, [#allocation4]  }
  0x19   :  { %s434_s11 = scalar_lea.vmem %s45_s7, 2048  ;;  %p439_p11 = scmp.lt.s32.totalorder %s45_s7, %s45_s7 }
  0x1a   :  { %p435_p10 = scmp.ne.s32.totalorder %s45_s7, %s434_s11  ;;  %p440_p12 = scmp.lt.s32.totalorder %s434_s11, %s434_s11 }
  0x1c   :  { %p441_p13 = por %p440_p12, %p439_p11 }
  0x1e   :  { %p442_p0 = pnand %p441_p13, %p435_p10 }
  0x20   :  { %445 = shalt.err (!%p442_p0)
}
  0x21   :  { %s477_s2 = smov 128   ;;  %s478_s12 = smov 8  }
  0x22   :  { %50 = dma.hbm_to_vmem [thread:$0]  %s565_s3, 2048, %s45_s7, [#allocation7], %s477_s2, %s477_s2, %s478_s12  }
  0x23   :  { %466 = dma.done.wait [#allocation4], 128  }
  0x24   :  { %467 = vsyncadd [#allocation4], 4294967168 }
  0x25   :  { %468 = dma.done.wait [#allocation7], 6144  }
  0x26   :  { %469 = vsyncadd [#allocation7], 4294961152  ;;  %v479_v0 = vmov 0.0   ;;  %v97_v1 = vld [vmem:[#allocation6 + $0xf8] sm:$0xff]  ;;  %v96_v2 = vld [vmem:[#allocation6 + $0xf0] sm:$0xff]  ;;  %vm480_vm0 = vmmov 0   ;;  %v100_v50 = vlaneseq }
  0x27   :  { %174 = vmatprep.mubr.f32.mxu0 %v479_v0  ;;  %331 = vmatprep.subr.mxu1 %v479_v0  ;;  %v95_v3 = vld [vmem:[#allocation6 + $0xe8] sm:$0xff]  ;;  %v94_v4 = vld [vmem:[#allocation6 + $0xe0] sm:$0xff]  ;;  %v93_v5 = vld [vmem:[#allocation6 + $0xd8] sm:$0xff]  ;;  %s481_s18 = smov [#allocation9]  }
  0x28   :  { %110 = vmatprep.subr.mxu0 %v97_v1  ;;  %v92_v6 = vld [vmem:[#allocation6 + $0xd0] sm:$0xff]  ;;  %v91_v7 = vld [vmem:[#allocation6 + $0xc8] sm:$0xff]  ;;  %v90_v8 = vld [vmem:[#allocation6 + $0xc0] sm:$0xff]  ;;  %363 = vmatprep.mubr.msk.f32.mxu1 %vm480_vm0, %v479_v0  ;;  %v101_v51 = vshrl.u32 %v100_v50, 7  ;;  %s301_s19 = sshll.u32 %s481_s18, 4  ;;  %s302_s19 = int_to_ptr.vmem [resolvable:$true] %s301_s19 }
  0x29   :  { %111 = vmatpush1.msra.mxu0 %v96_v2  ;;  %v89_v9 = vld [vmem:[#allocation6 + $0xb8] sm:$0xff]  ;;  %v88_v10 = vld [vmem:[#allocation6 + $0xb0] sm:$0xff]  ;;  %v87_v11 = vld [vmem:[#allocation6 + $0xa8] sm:$0xff]  ;;  %p451_p2 = scmp.lt.s32.totalorder %s302_s19, %s302_s19 }
  0x2a   :  { %112 = vmatprep.subr.mxu0 %v95_v3  ;;  %v86_v12 = vld [vmem:[#allocation6 + $0xa0] sm:$0xff]  ;;  %v85_v13 = vld [vmem:[#allocation6 + $0x98] sm:$0xff]  ;;  %v84_v14 = vld [vmem:[#allocation6 + $0x90] sm:$0xff]  ;;  %v102_v52 = vsub.s32 0, %v101_v51  ;;  %v106_v62 = vsub.s32 1, %v101_v51 }
  0x2b   :  { %113 = vmatpush1.msra.mxu0 %v94_v4  ;;  %v83_v15 = vld [vmem:[#allocation6 + $0x88] sm:$0xff]  ;;  %v82_v16 = vld [vmem:[#allocation6 + $0x80] sm:$0xff]  ;;  %v81_v17 = vld [vmem:[#allocation6 + $0x78] sm:$0xff] }
  0x2c   :  { %114 = vmatprep.subr.mxu0 %v93_v5  ;;  %v80_v18 = vld [vmem:[#allocation6 + $0x70] sm:$0xff]  ;;  %v79_v19 = vld [vmem:[#allocation6 + $0x68] sm:$0xff]  ;;  %v78_v20 = vld [vmem:[#allocation6 + $0x60] sm:$0xff] }
  0x2d   :  { %115 = vmatpush1.msra.mxu0 %v92_v6  ;;  %v77_v21 = vld [vmem:[#allocation6 + $0x58] sm:$0xff]  ;;  %v76_v22 = vld [vmem:[#allocation6 + $0x50] sm:$0xff]  ;;  %v75_v23 = vld [vmem:[#allocation6 + $0x48] sm:$0xff] }
  0x2e   :  { %116 = vmatprep.subr.mxu0 %v91_v7  ;;  %v74_v24 = vld [vmem:[#allocation6 + $0x40] sm:$0xff]  ;;  %v73_v25 = vld [vmem:[#allocation6 + $0x38] sm:$0xff]  ;;  %v72_v26 = vld [vmem:[#allocation6 + $0x30] sm:$0xff] }
  0x2f   :  { %117 = vmatpush1.msra.mxu0 %v90_v8  ;;  %v71_v27 = vld [vmem:[#allocation6 + $0x28] sm:$0xff]  ;;  %v70_v28 = vld [vmem:[#allocation6 + $0x20] sm:$0xff]  ;;  %v69_v29 = vld [vmem:[#allocation6 + $0x18] sm:$0xff] }
  0x30   :  { %118 = vmatprep.subr.mxu0 %v89_v9  ;;  %v68_v30 = vld [vmem:[#allocation6 + $0x10] sm:$0xff]  ;;  %v67_v31 = vld [vmem:[#allocation6 + $0x8] sm:$0xff]  ;;  %v66_v32 = vld [vmem:[#allocation6] sm:$0xff] }
  0x31   :  { %119 = vmatpush1.msra.mxu0 %v88_v10  ;;  %v528_v33 = vld [vmem:[#allocation3] sm:$0xff]  ;;  %v208_v35 = vld [vmem:[#allocation8 + $0x70] sm:$0xff]  ;;  %v207_v36 = vld [vmem:[#allocation8 + $0x68] sm:$0xff] }
  0x32   :  { %120 = vmatprep.subr.mxu0 %v87_v11  ;;  %v209_v34 = vld [vmem:[#allocation8 + $0x78] sm:$0xff]  ;;  %v206_v37 = vld [vmem:[#allocation8 + $0x60] sm:$0xff]  ;;  %v204_v39 = vld [vmem:[#allocation8 + $0x50] sm:$0xff]  ;;  %v289_v11 = vstv %s562_s0 }
  0x33   :  { %121 = vmatpush1.msra.mxu0 %v86_v12  ;;  %332 = vmatpush3.msra.mxu1 %v209_v34  ;;  %v205_v38 = vld [vmem:[#allocation8 + $0x58] sm:$0xff]  ;;  %v203_v40 = vld [vmem:[#allocation8 + $0x48] sm:$0xff]  ;;  %v202_v41 = vld [vmem:[#allocation8 + $0x40] sm:$0xff] }
  0x34   :  { %122 = vmatprep.subr.mxu0 %v85_v13  ;;  %333 = vmatprep.subr.mxu1 %v479_v0  ;;  %v201_v42 = vld [vmem:[#allocation8 + $0x38] sm:$0xff]  ;;  %v200_v43 = vld [vmem:[#allocation8 + $0x30] sm:$0xff]  ;;  %v199_v44 = vld [vmem:[#allocation8 + $0x28] sm:$0xff] }
  0x35   :  { %123 = vmatpush1.msra.mxu0 %v84_v14  ;;  %334 = vmatpush3.msra.mxu1 %v208_v35  ;;  %v198_v45 = vld [vmem:[#allocation8 + $0x20] sm:$0xff]  ;;  %v197_v46 = vld [vmem:[#allocation8 + $0x18] sm:$0xff]  ;;  %v196_v47 = vld [vmem:[#allocation8 + $0x10] sm:$0xff] }
  0x36   :  { %124 = vmatprep.subr.mxu0 %v83_v15  ;;  %335 = vmatprep.subr.mxu1 %v479_v0  ;;  %v195_v48 = vld [vmem:[#allocation8 + $0x8] sm:$0xff]  ;;  %v194_v49 = vld [vmem:[#allocation8] sm:$0xff]  ;;  %v98_v53 = vld [vmem:[%s566_s4] sm:$0x3] }
  0x37   :  { %125 = vmatpush1.msra.mxu0 %v82_v16  ;;  %336 = vmatpush3.msra.mxu1 %v207_v36  ;;  %v103_v54 = vrot.slane %v98_v53, %v102_v52  ;;  %v107_v63 = vrot.slane %v98_v53, %v106_v62  ;;  %v313_v5 = vld [vmem:[%s567_s5] ss:$0 sm:$0xff]  ;;  %s446_s5 = scalar_lea.vmem %s302_s19, 128 }
  0x38   :  { %126 = vmatprep.subr.mxu0 %v81_v17  ;;  %337 = vmatprep.subr.mxu1 %v479_v0  ;;  %p447_p1 = scmp.ne.s32.totalorder %s302_s19, %s446_s5  ;;  %p452_p3 = scmp.lt.s32.totalorder %s446_s5, %s446_s5 }
  0x39   :  { %127 = vmatpush1.msra.mxu0 %v80_v18  ;;  %338 = vmatpush3.msra.mxu1 %v206_v37 }
  0x3a   :  { %128 = vmatprep.subr.mxu0 %v79_v19  ;;  %339 = vmatprep.subr.mxu1 %v479_v0  ;;  %p453_p4 = por %p452_p3, %p451_p2 }
  0x3b   :  { %129 = vmatpush1.msra.mxu0 %v78_v20  ;;  %340 = vmatpush3.msra.mxu1 %v205_v38 }
  0x3c   :  { %130 = vmatprep.subr.mxu0 %v77_v21  ;;  %341 = vmatprep.subr.mxu1 %v479_v0  ;;  %p454_p5 = pnand %p453_p4, %p447_p1 }
  0x3d   :  { %131 = vmatpush1.msra.mxu0 %v76_v22  ;;  %342 = vmatpush3.msra.mxu1 %v204_v39 }
  0x3e   :  { %132 = vmatprep.subr.mxu0 %v75_v23  ;;  %343 = vmatprep.subr.mxu1 %v479_v0 }
  0x3f   :  { %133 = vmatpush1.msra.mxu0 %v74_v24  ;;  %344 = vmatpush3.msra.mxu1 %v203_v40 }
  0x40   :  { %134 = vmatprep.subr.mxu0 %v73_v25  ;;  %345 = vmatprep.subr.mxu1 %v479_v0 }
  0x41   :  { %135 = vmatpush1.msra.mxu0 %v72_v26  ;;  %346 = vmatpush3.msra.mxu1 %v202_v41 }
  0x42   :  { %136 = vmatprep.subr.mxu0 %v71_v27  ;;  %347 = vmatprep.subr.mxu1 %v479_v0 }
  0x43   :  { %137 = vmatpush1.msra.mxu0 %v70_v28  ;;  %348 = vmatpush3.msra.mxu1 %v201_v42 }
  0x44   :  { %138 = vmatprep.subr.mxu0 %v69_v29  ;;  %349 = vmatprep.subr.mxu1 %v479_v0 }
  0x45   :  { %139 = vmatpush1.msra.mxu0 %v68_v30  ;;  %350 = vmatpush3.msra.mxu1 %v200_v43 }
  0x46   :  { %140 = vmatprep.subr.mxu0 %v67_v31  ;;  %351 = vmatprep.subr.mxu1 %v479_v0 }
  0x47   :  { %141 = vmatpush1.msra.mxu0 %v66_v32  ;;  %352 = vmatpush3.msra.mxu1 %v199_v44 }
  0x48   :  { %175 = vmatmul.mubr.f32.vlgmr.msra.gmra.mxu0 %v528_v33  ;;  %353 = vmatprep.subr.mxu1 %v479_v0 }
  0x49   :  { %354 = vmatpush3.msra.mxu1 %v198_v45 }
  0x4a   :  { %355 = vmatprep.subr.mxu1 %v479_v0 }
  0x4b   :  { %356 = vmatpush3.msra.mxu1 %v197_v46 }
  0x4c   :  { %357 = vmatprep.subr.mxu1 %v479_v0 }
  0x4d   :  { %358 = vmatpush3.msra.mxu1 %v196_v47 }
  0x4e   :  { %359 = vmatprep.subr.mxu1 %v479_v0 }
  0x4f   :  { %360 = vmatpush3.msra.mxu1 %v195_v48 }
  0x50   :  { %361 = vmatprep.subr.mxu1 %v479_v0 }
  0x51   :  { %362 = vmatpush3.msra.mxu1 %v194_v49 }
 0x108   :  { %v176_v55 = vpop.f32.mrf.mxu0 }
 0x109   :  { %v177_v56 = vadd.f32 %v176_v55, %v103_v54 }
 0x10a   :  { %v178_v0 = vpop.f32.mrf.mxu0 }
 0x10b   :  { %v311_v57 = vmul.f32 -1.442695, %v177_v56  ;;  %v179_v1 = vadd.f32 %v178_v0, %v107_v63 }
 0x10d   :  { %376 = vpow2.f32 %v311_v57  ;;  %v312_v2 = vmul.f32 -1.442695, %v179_v1 }
 0x11a   :  { %v377_v58 = vpop.eup %376 }
 0x11b   :  { %v184_v59 = vadd.f32 1.0, %v377_v58 }
 0x11d   :  { %378 = vrcp.f32 %v184_v59 }
 0x11e   :  { %380 = vpow2.f32 %v312_v2 }
 0x12a   :  { %v379_v60 = vpop.eup %378 }
 0x12b   :  { %v193_v61 = vmul.f32 %v379_v60, %v528_v33  ;;  %v381_v3 = vpop.eup %380 }
 0x12c   :  { %v190_v4 = vadd.f32 1.0, %v381_v3 }
 0x12d   :  { %364 = vmatmul.mubr.f32.vlgmr.msra.gmra.mxu1 %v193_v61 }
 0x12e   :  { %382 = vrcp.f32 %v190_v4 }
 0x13b   :  { %v383_v9 = vpop.eup %382 }
 0x13c   :  { %v288_v10 = vsub.f32 1.0, %v383_v9 }
 0x13e   :  { %v290_v13 = vmul.f32 %v289_v11, %v288_v10 }
 0x1ed   :  { %v283_v6 = vpop.f32.mrf.mxu1 }
 0x1ee   :  { %v284_v7 = vadd.f32 %v313_v5, %v283_v6 }
 0x1ef   :  { %v365_v8 = vpop.f32.mrf.mxu1 }
 0x1f0   :  { %384 = vtanh.f32 %v284_v7 }
 0x1fd   :  { %v385_v12 = vpop.eup %384 }
 0x1fe   :  { %v291_v14 = vsub.f32 %v385_v12, %v528_v33 }
 0x200   :  { %v292_v15 = vmul.f32 %v291_v14, %v290_v13 }
 0x202   :  { %v293_v16 = vadd.f32 %v292_v15, %v528_v33 }
 0x204   :  { %294 = vst [vmem:[#allocation9] sm:$0xff] %v293_v16 }
 0x205   :  { %457 = shalt.err (!%p454_p5)
}
 0x206   :  { %304 = dma.vmem_to_hbm [thread:$0]  %s302_s19, 128, %s568_s6, [#allocation5]  }
 0x207   :  { %470 = dma.done.wait [#allocation5], 128  }
 0x208   :  { %471 = vsyncadd [#allocation5], 4294967168 }
 0x209   :  { %308 = vsyncpa [#allocation4], 1 }
 0x20a   :  { %309 = vsyncpa [#allocation7], 1 }
 0x20b   :  { %310 = vsyncpa [#allocation5], 1 }

</bundles_post_ra>
